<compile_context>
chip_gen: v7x
topology: tpu7x:2x2x1
jax: 0.10.0
libtpu: 0.0.40
codegen_flags: <defaults>
</compile_context>

<pallas_src>
import jax
import jax.numpy as jnp
from jax import lax
from jax.experimental import pallas as pl
from jax.experimental.pallas import tpu as pltpu

IN_FEATURES = 27
HIDDEN = 512
OUT_FEATURES = 1


def _round_up(x, m):
    return ((x + m - 1) // m) * m


def _pick_tile(B, tile_b):
    """Batch-tile size. Small B -> single 8-aligned tile. Larger B -> 128-aligned
    tiles, capped so the grid has at least 2 steps (v7x megacore sharding)."""
    if B <= 512:
        return max(8, _round_up(B, 8))
    cap_two_steps = _round_up(pl.cdiv(B, 2), 128)
    return min(_round_up(tile_b, 128), cap_two_steps)


def _pick_chunk(tb):
    """Rows per inner-loop chunk. Bounds the live (chunk, 512) f32 intermediate."""
    if tb <= 512:
        return tb
    for c in (512, 256, 128):
        if tb % c == 0:
            return c
    return tb  # unreachable for 128-aligned tb


def _make_kernel(chunk, n_chunks):
    def kernel(x_ref, w1_ref, b1_ref, w2_ref, b2_ref, o_ref):
        # x:  (TILE_B, 27)  f32   batch tile (cast to bf16 in-kernel for MXU)
        # w1: (27, 512)     bf16  pinned in VMEM across tiles
        # b1: (1, 512)      f32   pinned
        # w2: (1, 512)      f32   linear2 weight as a lane-major row, pinned
        # b2: (1, 1)        f32   pinned
        # o:  (TILE_B, 1)   f32
        w1 = w1_ref[...]
        b1 = b1_ref[...]
        w2 = w2_ref[...]
        b2 = b2_ref[...]

        def compute(off):
            xb = x_ref[pl.ds(off, chunk), :].astype(jnp.bfloat16)
            h = jnp.dot(xb, w1, preferred_element_type=jnp.float32)
            h = jnp.maximum(h + b1, 0.0)                      # bias + ReLU (VPU, f32)
            # 512 -> 1 layer as VPU multiply + cross-lane reduce (XLU); avoids a
            # second MXU pass that would use 1 of 128/256 result columns.
            row = jnp.sum(h * w2, axis=-1, keepdims=True)     # (chunk, 1)
            o_ref[pl.ds(off, chunk), :] = (row + b2).astype(o_ref.dtype)

        if n_chunks == 1:
            compute(0)
        else:
            def body(c, carry):
                compute(pl.multiple_of(c * chunk, chunk))
                return carry
            lax.fori_loop(0, n_chunks, body, 0, unroll=True)

    return kernel


def simple_network_forward(x, w1, b1, w2, b2, *, tile_b=4096):
    """x: (B, 27) float32 -> (B, 1) float32.

    w1: (27, 512)  == linear1.weight.T
    b1: (512,)     == linear1.bias
    w2: (512, 1)   == linear2.weight.T
    b2: (1,)       == linear2.bias
    """
    B = x.shape[0]

    tb = _pick_tile(B, tile_b)
    b_pad = _round_up(B, tb)
    grid = (pl.cdiv(b_pad, tb),)
    chunk = _pick_chunk(tb)
    n_chunks = tb // chunk

    # Only remainder-row padding (zero-size when B divides tb); x stays f32.
    x_p = x if b_pad == B else jnp.pad(x, ((0, b_pad - B), (0, 0)))
    x_p = x_p.astype(jnp.float32)

    # Weights: bf16 only for the MXU operand; everything else f32.
    w1_b = w1.astype(jnp.bfloat16)
    b1_2d = b1.reshape(1, HIDDEN).astype(jnp.float32)
    w2_row = w2.reshape(1, HIDDEN).astype(jnp.float32)       # (512,1) -> (1,512)
    b2_2d = b2.reshape(1, OUT_FEATURES).astype(jnp.float32)

    flops = 2 * b_pad * IN_FEATURES * HIDDEN + 4 * b_pad * HIDDEN
    bytes_accessed = (
        b_pad * IN_FEATURES * 4           # x read (f32, streamed once)
        + b_pad * 4                       # out write (f32)
        + w1_b.size * 2                   # w1 (bf16), read once
        + (b1_2d.size + w2_row.size + b2_2d.size) * 4
    )

    out = pl.pallas_call(
        _make_kernel(chunk, n_chunks),
        out_shape=jax.ShapeDtypeStruct((b_pad, OUT_FEATURES), jnp.float32),
        grid=grid,
        in_specs=[
            pl.BlockSpec((tb, IN_FEATURES), lambda i: (i, 0)),      # batch tile
            pl.BlockSpec((IN_FEATURES, HIDDEN), lambda i: (0, 0)),  # pinned
            pl.BlockSpec((1, HIDDEN), lambda i: (0, 0)),            # pinned
            pl.BlockSpec((1, HIDDEN), lambda i: (0, 0)),            # pinned
            pl.BlockSpec((1, OUT_FEATURES), lambda i: (0, 0)),      # pinned
        ],
        out_specs=pl.BlockSpec((tb, OUT_FEATURES), lambda i: (i, 0)),
        compiler_params=pltpu.CompilerParams(
            dimension_semantics=("parallel",),
            vmem_limit_bytes=32 * 1024 * 1024,
        ),
        cost_estimate=pl.CostEstimate(
            flops=flops, transcendentals=0, bytes_accessed=bytes_accessed),
    )(x_p, w1_b, b1_2d, w2_row, b2_2d)

    return out[:B]


def init_params(key):
    """Deterministic init mimicking PyTorch nn.Linear default:
    U(-1/sqrt(fan_in), 1/sqrt(fan_in)) for both weight and bias."""
    k1, k2, k3, k4 = jax.random.split(key, 4)
    bound1 = 1.0 / jnp.sqrt(jnp.float32(IN_FEATURES))
    bound2 = 1.0 / jnp.sqrt(jnp.float32(HIDDEN))
    w1 = jax.random.uniform(k1, (IN_FEATURES, HIDDEN), jnp.float32, -bound1, bound1)
    b1 = jax.random.uniform(k2, (HIDDEN,), jnp.float32, -bound1, bound1)
    w2 = jax.random.uniform(k3, (HIDDEN, OUT_FEATURES), jnp.float32, -bound2, bound2)
    b2 = jax.random.uniform(k4, (OUT_FEATURES,), jnp.float32, -bound2, bound2)
    return w1, b1, w2, b2


def _check(x, w1, b1, w2, b2):
    out = jax.block_until_ready(simple_network_forward(x, w1, b1, w2, b2))
    assert out.shape == (x.shape[0], OUT_FEATURES)

    # Reference 1: same math as the kernel (bf16-cast MXU operands, f32 accum).
    xb = x.astype(jnp.bfloat16).astype(jnp.float32)
    w1b = w1.astype(jnp.bfloat16).astype(jnp.float32)
    ref_bf16_in = jnp.maximum(xb @ w1b + b1, 0.0) @ w2 + b2
    assert jnp.allclose(out, ref_bf16_in, atol=1e-3, rtol=1e-3)

    # Reference 2: full-f32 PyTorch-equivalent forward (looser tol: bf16 MXU inputs).
    ref_f32 = jnp.maximum(x @ w1 + b1, 0.0) @ w2 + b2
    assert jnp.allclose(out, ref_f32, atol=5e-2, rtol=5e-2)


if __name__ == "__main__":
    key = jax.random.PRNGKey(0)
    k_x, k_x2, k_p = jax.random.split(key, 3)
    w1, b1, w2, b2 = init_params(k_p)

    # Small batch: single tile, single chunk.
    x_small = jax.random.normal(k_x, (8, IN_FEATURES), jnp.float32)
    _check(x_small, w1, b1, w2, b2)

    # Larger batch: exercises the 2-step grid + chunked inner loop + remainder pad.
    x_big = jax.random.normal(k_x2, (1200, IN_FEATURES), jnp.float32)
    _check(x_big, w1, b1, w2, b2)

    print("KERNEL_OK")
</pallas_src>

<mosaic_0001>
module attributes {stable_mosaic.version = 11 : i64} {
  func.func @kernel(%arg0: i32, %arg1: memref<8x27xf32, #tpu.memory_space<vmem>>, %arg2: memref<27x512xbf16, #tpu.memory_space<vmem>>, %arg3: memref<1x512xf32, #tpu.memory_space<vmem>>, %arg4: memref<1x512xf32, #tpu.memory_space<vmem>>, %arg5: memref<1x1xf32, #tpu.memory_space<vmem>>, %arg6: memref<8x1xf32, #tpu.memory_space<vmem>>) attributes {dimension_semantics = [#tpu.dimension_semantics<parallel>], iteration_bounds = array<i64: 1>, scalar_prefetch = 0 : i64, scratch_operands = 0 : i64, tpu.core_type = #tpu.core_type<tc>, window_params = [{transform_indices = @transform_0, window_bounds = array<i64: 8, 27>}, {pipeline_mode = #tpu.pipeline_mode<synchronous>, transform_indices = @transform_1, window_bounds = array<i64: 27, 512>}, {pipeline_mode = #tpu.pipeline_mode<synchronous>, transform_indices = @transform_2, window_bounds = array<i64: 1, 512>}, {pipeline_mode = #tpu.pipeline_mode<synchronous>, transform_indices = @transform_3, window_bounds = array<i64: 1, 512>}, {pipeline_mode = #tpu.pipeline_mode<synchronous>, transform_indices = @transform_4, window_bounds = array<i64: 1, 1>}, {transform_indices = @transform_5, window_bounds = array<i64: 8, 1>}]} {
    %c0 = arith.constant 0 : index
    %c0_0 = arith.constant 0 : index
    %0 = vector.load %arg2[%c0, %c0_0] : memref<27x512xbf16, #tpu.memory_space<vmem>>, vector<27x512xbf16>
    %c0_1 = arith.constant 0 : index
    %c0_2 = arith.constant 0 : index
    %1 = vector.load %arg3[%c0_1, %c0_2] : memref<1x512xf32, #tpu.memory_space<vmem>>, vector<1x512xf32>
    %c0_3 = arith.constant 0 : index
    %c0_4 = arith.constant 0 : index
    %2 = vector.load %arg4[%c0_3, %c0_4] : memref<1x512xf32, #tpu.memory_space<vmem>>, vector<1x512xf32>
    %c0_5 = arith.constant 0 : index
    %c0_6 = arith.constant 0 : index
    %3 = vector.load %arg5[%c0_5, %c0_6] : memref<1x1xf32, #tpu.memory_space<vmem>>, vector<1x1xf32>
    %c0_7 = arith.constant 0 : index
    %c0_8 = arith.constant 0 : index
    %4 = vector.load %arg1[%c0_7, %c0_8] : memref<8x27xf32, #tpu.memory_space<vmem>>, vector<8x27xf32>
    %5 = arith.truncf %4 : vector<8x27xf32> to vector<8x27xbf16>
    %cst = arith.constant dense<0.000000e+00> : vector<8x512xf32>
    %6 = tpu.matmul %5, %0, %cst {dimension_numbers = #tpu.dot_dimension_numbers<[1], [0], [0], [1], [0, 0, 1, 1], [], []>} : vector<8x27xbf16>, vector<27x512xbf16>, vector<8x512xf32> -> vector<8x512xf32>
    %7 = vector.broadcast %1 : vector<1x512xf32> to vector<8x512xf32>
    %8 = arith.addf %6, %7 : vector<8x512xf32>
    %cst_9 = arith.constant 0.000000e+00 : f32
    %9 = vector.broadcast %cst_9 : f32 to vector<8x512xf32>
    %10 = arith.maximumf %8, %9 : vector<8x512xf32>
    %11 = vector.broadcast %2 : vector<1x512xf32> to vector<8x512xf32>
    %12 = arith.mulf %10, %11 : vector<8x512xf32>
    %cst_10 = arith.constant dense<0.000000e+00> : vector<8xf32>
    %13 = vector.multi_reduction <add>, %12, %cst_10 [1] : vector<8x512xf32> to vector<8xf32>
    %14 = vector.shape_cast %13 : vector<8xf32> to vector<8x1xf32>
    %15 = vector.broadcast %3 : vector<1x1xf32> to vector<8x1xf32>
    %16 = arith.addf %14, %15 : vector<8x1xf32>
    %c0_11 = arith.constant 0 : index
    %c0_12 = arith.constant 0 : index
    %17 = vector.load %arg6[%c0_11, %c0_12] : memref<8x1xf32, #tpu.memory_space<vmem>>, vector<8x1xf32>
    tpu.vector_store %arg6[%c0_11, %c0_12], %16 {strides = array<i32>} : memref<8x1xf32, #tpu.memory_space<vmem>>, vector<8x1xf32>,
    return
  }
  func.func @transform_0(%arg0: i32) -> (i32, i32) {
    %c0_i32 = arith.constant 0 : i32
    %c0_i32_0 = arith.constant 0 : i32
    return %arg0, %c0_i32 : i32, i32
  }
  func.func @transform_1(%arg0: i32) -> (i32, i32) {
    %c0_i32 = arith.constant 0 : i32
    %c0_i32_0 = arith.constant 0 : i32
    %c0_i32_1 = arith.constant 0 : i32
    return %c0_i32, %c0_i32_0 : i32, i32
  }
  func.func @transform_2(%arg0: i32) -> (i32, i32) {
    %c0_i32 = arith.constant 0 : i32
    %c0_i32_0 = arith.constant 0 : i32
    %c0_i32_1 = arith.constant 0 : i32
    return %c0_i32, %c0_i32_0 : i32, i32
  }
  func.func @transform_3(%arg0: i32) -> (i32, i32) {
    %c0_i32 = arith.constant 0 : i32
    %c0_i32_0 = arith.constant 0 : i32
    %c0_i32_1 = arith.constant 0 : i32
    return %c0_i32, %c0_i32_0 : i32, i32
  }
  func.func @transform_4(%arg0: i32) -> (i32, i32) {
    %c0_i32 = arith.constant 0 : i32
    %c0_i32_0 = arith.constant 0 : i32
    %c0_i32_1 = arith.constant 0 : i32
    return %c0_i32, %c0_i32_0 : i32, i32
  }
  func.func @transform_5(%arg0: i32) -> (i32, i32) {
    %c0_i32 = arith.constant 0 : i32
    %c0_i32_0 = arith.constant 0 : i32
    return %arg0, %c0_i32 : i32, i32
  }
}

</mosaic_0001>

<bundles_post_ra>
// kernel: tpu_custom_call.1
= control target key start
LH: loop header
LB: loop body
LE: loop exit
PB: predicated region body
PF: predicated region fallthrough
CT: control target
= control target key end

     0   :  { %s426_s0 = inlined_call_operand.hbm [shape: f32[8,27], index: 0, kind: input, shape index: {}]   ;;  %s427_s1 = inlined_call_operand.hbm [shape: bf16[27,512], index: 1, kind: input, shape index: {}]   ;;  %s428_s2 = inlined_call_operand.vmem [shape: f32[1,512], index: 2, kind: input, shape index: {}]   ;;  %s429_s3 = inlined_call_operand.vmem [shape: f32[1,512], index: 3, kind: input, shape index: {}]   ;;  %s430_s4 = inlined_call_operand.<no memory space> [shape: f32[1,1], index: 4, kind: input, shape index: {}]   ;;  %s431_s5 = inlined_call_operand.vmem [shape: f32[8,1], index: 5, kind: output, shape index: {}]  }
   0x1   :  { %v10_v0 = vstv %s430_s4 }
   0x2   :  { %11 = vst [vmem:[#allocation2] sm:$0x1] %v10_v0 }
   0x3   :  { %12 = vsyncpa [#allocation4], 0 }
   0x4   :  { %13 = vsyncpa [#allocation6], 0  ;;  %s347_s20 = smov [#allocation3]   ;;  %s348_s22 = smov [#allocation5]  }
   0x5   :  { %s20_s21 = sshll.u32 %s347_s20, 4  ;;  %s29_s23 = sshll.u32 %s348_s22, 4  ;;  %s21_s21 = int_to_ptr.vmem [resolvable:$true] %s20_s21  ;;  %s386_s23 = int_to_ptr.vmem [resolvable:$true] %s29_s23 }
   0x6   :  { %s299_s26 = scalar_lea.hbm %s426_s0, 128 }
   0x7   :  { %p300_p0 = scmp.ne.s32.totalorder %s426_s0, %s299_s26  ;;  %p303_p1 = scmp.lt.u32.totalorder %s299_s26, %s426_s0 }
   0x9   :  { %p305_p2 = pnand %p303_p1, %p300_p0 }
   0xb   :  { %308 = shalt.err (!%p305_p2)
}
   0xc   :  { %s309_s30 = scalar_lea.vmem %s21_s21, 128  ;;  %p314_p4 = scmp.lt.s32.totalorder %s21_s21, %s21_s21 }
   0xd   :  { %p310_p3 = scmp.ne.s32.totalorder %s21_s21, %s309_s30  ;;  %p315_p5 = scmp.lt.s32.totalorder %s309_s30, %s309_s30 }
   0xf   :  { %p316_p6 = por %p315_p5, %p314_p4 }
  0x11   :  { %p317_p7 = pnand %p316_p6, %p310_p3 }
  0x13   :  { %320 = shalt.err (!%p317_p7)
}
  0x14   :  { %23 = dma.hbm_to_vmem [thread:$0]  %s426_s0, 128, %s21_s21, [#allocation4]  }
  0x15   :  { %s321_s10 = scalar_lea.hbm %s427_s1, 1024 }
  0x16   :  { %p322_p8 = scmp.ne.s32.totalorder %s427_s1, %s321_s10  ;;  %p325_p9 = scmp.lt.u32.totalorder %s321_s10, %s427_s1 }
  0x18   :  { %p327_p10 = pnand %p325_p9, %p322_p8 }
  0x1a   :  { %330 = shalt.err (!%p327_p10)
}
  0x1b   :  { %s331_s15 = scalar_lea.vmem %s386_s23, 1024  ;;  %p336_p12 = scmp.lt.s32.totalorder %s386_s23, %s386_s23 }
  0x1c   :  { %p332_p11 = scmp.ne.s32.totalorder %s386_s23, %s331_s15  ;;  %p337_p13 = scmp.lt.s32.totalorder %s331_s15, %s331_s15 }
  0x1e   :  { %p338_p0 = por %p337_p13, %p336_p12 }
  0x20   :  { %p339_p1 = pnand %p338_p0, %p332_p11 }
  0x22   :  { %342 = shalt.err (!%p339_p1)
}
  0x23   :  { %s349_s0 = smov 256   ;;  %s350_s16 = smov 16  }
  0x24   :  { %35 = dma.hbm_to_vmem [thread:$0]  %s427_s1, 1024, %s386_s23, [#allocation6], %s349_s0, %s349_s0, %s350_s16  }
  0x25   :  { %343 = dma.done.wait [#allocation4], 128  }
  0x26   :  { %344 = vsyncadd [#allocation4], 4294967168 }
  0x27   :  { %345 = dma.done.wait [#allocation6], 1024  }
  0x28   :  { %346 = vsyncadd [#allocation6], 4294966272  ;;  %v351_v1 = vmov 0   ;;  %vm123_vm0 = vcmask 1044480   ;;  %vm124_vm1 = vcmask 1045504   ;;  %v352_v2 = vmov 65535  }
  0x29   :  { %171 = vmatprep.mubr.bf16.mxu0 %v351_v1  ;;  %212 = vmatprep.mubr.bf16.mxu1 %v351_v1  ;;  %v125_v3 = vsel %vm123_vm0, 4294967295, %v352_v2  ;;  %v287_v4 = vld [vmem:[#allocation5 + $0x4] ss:$16 sps:$4 sm:$0xff]   ;;  %v289_v5 = vld [vmem:[#allocation5 + $0xc] ss:$16 sps:$4 sm:$0xff]   ;;  %vm119_vm2 = vcmask 220160   ;;  %v63_v19 = vlaneseq }
  0x2a   :  { %139 = vmatprep.subr.bf16.mxu0 %v287_v4  ;;  %v291_v6 = vld [vmem:[#allocation5] ss:$16 sps:$4 sm:$0xff]   ;;  %v292_v7 = vld [vmem:[#allocation5 + $0x8] ss:$16 sps:$4 sm:$0xff]   ;;  %v126_v8 = vsel %vm124_vm1, %v125_v3, 0  ;;  %180 = vmatprep.subr.bf16.mxu1 %v289_v5  ;;  %vm262_vm3 = vcmask 7168  }
  0x2b   :  { %v293_v9 = vld [vmem:[#allocation5 + $0x24] ss:$16 sps:$4 sm:$0x3f]   ;;  %140 = vmatpush1.bf16.msra.mxu0 %v291_v6  ;;  %181 = vmatpush1.bf16.msra.mxu1 %v292_v7  ;;  %v295_v10 = vld [vmem:[#allocation5 + $0x2c] ss:$16 sps:$4 sm:$0x3f]  }
  0x2c   :  { %v60_v11 = vld [vmem:[#allocation3] sm:$0xff]  ;;  %v131_v12 = vand.u32 %v293_v9, %v126_v8  ;;  %v297_v13 = vld [vmem:[#allocation5 + $0x20] ss:$16 sps:$4 sm:$0x3f]   ;;  %v137_v15 = vand.u32 %v295_v10, %v126_v8  ;;  %v64_v20 = vshrl.u32 %v63_v19, 7 }
  0x2d   :  { %v298_v14 = vld [vmem:[#allocation5 + $0x28] ss:$16 sps:$4 sm:$0x3f]   ;;  %v128_v16 = vand.u32 %v297_v13, %v126_v8  ;;  %v61_v18 = vpack.c.bf16 %v60_v11, %v60_v11  ;;  %v280_v58 = vld [vmem:[#allocation2] ss:$0 sm:$0xff] }
  0x2e   :  { %141 = vmatprep.subr.bf16.mxu0 %v131_v12  ;;  %v134_v17 = vand.u32 %v298_v14, %v126_v8  ;;  %182 = vmatprep.subr.bf16.mxu1 %v137_v15  ;;  %v65_v21 = vsub.s32 0, %v64_v20  ;;  %v73_v22 = vsub.s32 2, %v64_v20  ;;  %v57_v23 = vld [vmem:[%s428_s2] sm:$0xf]  ;;  %v69_v24 = vsub.s32 1, %v64_v20 }
  0x2f   :  { %142 = vmatpush1.bf16.msra.mxu0 %v128_v16  ;;  %v77_v25 = vsub.s32 3, %v64_v20  ;;  %v58_v28 = vld [vmem:[%s429_s3] sm:$0xf] }
  0x30   :  { %183 = vmatpush1.bf16.msra.mxu1 %v134_v17  ;;  %v66_v26 = vrot.slane %v57_v23, %v65_v21  ;;  %v74_v27 = vrot.slane %v57_v23, %v73_v22  ;;  %v70_v29 = vrot.slane %v57_v23, %v69_v24  ;;  %v229_v34 = vrot.slane %v58_v28, %v65_v21 }
  0x31   :  { %v78_v30 = vrot.slane %v57_v23, %v77_v25  ;;  %v237_v38 = vrot.slane %v58_v28, %v73_v22  ;;  %v233_v40 = vrot.slane %v58_v28, %v69_v24  ;;  %v241_v53 = vrot.slane %v58_v28, %v77_v25 }
  0x32   :  { %278 = vmatmul.mubr.msk.bf16.vlgmr.msra.gmra.mrb[0].mxu0 %vm119_vm2, %v61_v18 }
  0x33   :  { %279 = vmatmul.mubr.msk.bf16.vlgmr.msra.gmra.mrb[0].mxu1 %vm119_vm2, %v61_v18 }
 0x105   :  { %v173_v31 = vpop.f32.mrb[0].mxu0 }
 0x106   :  { %v214_v32 = vpop.f32.mrb[0].mxu1  ;;  %v174_v33 = vadd.f32 %v173_v31, %v66_v26  ;;  %v175_v36 = vpop.f32.mrb[1].mxu0 }
 0x107   :  { %v215_v35 = vadd.f32 %v214_v32, %v74_v27  ;;  %v216_v37 = vpop.f32.mrb[1].mxu1  ;;  %v176_v39 = vadd.f32 %v175_v36, %v70_v29  ;;  %v177_v42 = vpop.f32.mrb[2].mxu0 }
 0x108   :  { %v217_v41 = vadd.f32 %v216_v37, %v78_v30  ;;  %v218_v43 = vpop.f32.mrb[2].mxu1  ;;  %v221_v44 = vmax.f32 %v174_v33, 0.0  ;;  %v178_v46 = vpop.f32.mrb[3].mxu0 }
 0x109   :  { %v223_v45 = vmax.f32 %v215_v35, 0.0  ;;  %v219_v47 = vpop.f32.mrb[3].mxu1  ;;  %v222_v48 = vmax.f32 %v176_v39, 0.0 }
 0x10a   :  { %v246_v49 = vmul.f32 %v229_v34, %v221_v44  ;;  %v224_v52 = vmax.f32 %v217_v41, 0.0 }
 0x10b   :  { %v248_v50 = vmul.f32 %v237_v38, %v223_v45  ;;  %v247_v51 = vmul.f32 %v233_v40, %v222_v48 }
 0x10c   :  { %v249_v55 = vmul.f32 %v241_v53, %v224_v52 }
 0x10d   :  { %v250_v54 = vadd.f32 %v247_v51, %v246_v49 }
 0x10f   :  { %v251_v56 = vadd.f32 %v250_v54, %v248_v50 }
 0x111   :  { %v252_v57 = vadd.f32 %v251_v56, %v249_v55 }
 0x113   :  { %253 = vadd.xlane.f32.xlu0 %v252_v57 }
 0x1a0   :  { %v254_v59 = vpop.xlane.xlu0 %253 }
 0x1a1   :  { %v261_v60 = vadd.f32 %v280_v58, %v254_v59 }
 0x1a3   :  { %263 = vst.msk [vmem:[%s431_s5] sm:$0xff] %vm262_vm3, %v261_v60 }
 0x1a4   :  { %268 = vsyncpa [#allocation4], 1 }
 0x1a5   :  { %269 = vsyncpa [#allocation6], 1 }

</bundles_post_ra>
